<compile_context>
chip_gen: v7x
topology: tpu7x:2x2x1
jax: 0.10.0
libtpu: 0.0.40
codegen_flags: <defaults>
</compile_context>

<pallas_src>
import jax
import jax.numpy as jnp
from jax.experimental import pallas as pl
from jax.experimental.pallas import tpu as pltpu

HIDDEN = 256          # hidden width of linear1 (fixed by the PyTorch module)
A_PAD = 128           # lane-dense padded action dimension
NEG_MASK = -1e30      # bias value for padded action lanes (exp underflows to 0)


def net_kernel(x_ref, w1_ref, b1_ref, w2_ref, b2_ref, o_ref):
    # x:  (TB, D)      bf16 (or f32; cast below is a no-op for bf16)
    # w1: (D, H)       bf16   b1: (1, H)      f32
    # w2: (H, A_PAD)   bf16   b2: (1, A_PAD)  f32 (padded lanes = NEG_MASK)
    # o:  (TB, A_PAD)  f32
    x = x_ref[...].astype(jnp.bfloat16)

    # linear1 + ReLU  (bf16 MXU matmul, f32 accumulation)
    h = jnp.dot(x, w1_ref[...], preferred_element_type=jnp.float32) + b1_ref[...]
    h = jnp.maximum(h, 0.0)

    # linear2 into lane-dense (TB, 128) logits; padded lanes get NEG_MASK from
    # the bias (w2 padded columns are zero), so no explicit mask is needed.
    logits = jnp.dot(h.astype(jnp.bfloat16), w2_ref[...],
                     preferred_element_type=jnp.float32) + b2_ref[...]

    # numerically stable softmax over dim=1 (last axis); padded lanes -> 0
    m = jnp.max(logits, axis=-1, keepdims=True)
    e = jnp.exp(logits - m)
    denom = jnp.sum(e, axis=-1, keepdims=True)
    inv = pl.reciprocal(denom, approx=False)   # exact: rows sum to 1 to ~1e-6
    o_ref[...] = (e * inv).astype(o_ref.dtype)


def _num_tensorcores():
    """v7x has 2 TensorCores per chip; v5e/v6e (and CPU interpret) have 1."""
    try:
        kind = jax.devices()[0].device_kind.lower()
        if "v7" in kind:
            return 2
    except Exception:
        pass
    return 1


def net_forward(x, w1, b1, w2, b2):
    """Returns lane-padded (B, A_PAD) softmax probabilities.

    Columns >= NActions are exactly 0, so argmax / sampling can consume the
    padded output directly (no extra XLA slice kernel)."""
    B, D = x.shape
    H = w1.shape[1]
    assert w1.shape == (D, H) and b1.shape == (1, H)
    assert w2.shape == (H, A_PAD) and b2.shape == (1, A_PAD)

    # Grid sizing:
    #   * 1-TC chips (v5e/v6e): one step over the whole batch -> no per-step
    #     pipeline overhead, no batch padding, block == full array dims.
    #   * v7x (2 TCs): exactly two balanced steps (TB = ceil(B/2) rounded to a
    #     sublane multiple of 8), batch axis marked "parallel".
    n_tc = _num_tensorcores()
    if n_tc > 1 and B >= 2 * 8:
        nb = n_tc
        tb = ((B + nb - 1) // nb + 7) // 8 * 8
        bp = tb * nb
    else:
        nb, tb, bp = 1, B, B
    if bp != B:  # only hit on v7x when the batch doesn't split evenly
        x = jnp.pad(x, ((0, bp - B), (0, 0)))

    out = pl.pallas_call(
        net_kernel,
        out_shape=jax.ShapeDtypeStruct((bp, A_PAD), jnp.float32),
        grid=(nb,),
        in_specs=[
            pl.BlockSpec((tb, D), lambda i: (i, 0)),       # x tile per grid step
            pl.BlockSpec((D, H), lambda i: (0, 0)),        # w1 (resident)
            pl.BlockSpec((1, H), lambda i: (0, 0)),        # b1
            pl.BlockSpec((H, A_PAD), lambda i: (0, 0)),    # w2 (lane-padded)
            pl.BlockSpec((1, A_PAD), lambda i: (0, 0)),    # b2 (mask baked in)
        ],
        out_specs=pl.BlockSpec((tb, A_PAD), lambda i: (i, 0)),
        compiler_params=pltpu.CompilerParams(
            dimension_semantics=("parallel",)),            # batch axis -> megacore
    )(x, w1, b1, w2, b2)
    return out[:B] if bp != B else out


def init_params(key, nstates, nactions):
    """nn.Linear-style init U(-1/sqrt(fan_in), 1/sqrt(fan_in)).
    Weights stored transposed as (in, out); w1/w2 cast to bf16. The action
    dimension of w2 is zero-padded to A_PAD lanes; b2's padded lanes hold
    NEG_MASK so the softmax mask is free inside the kernel."""
    d_in = nstates * nstates * 4
    hidden = HIDDEN
    k1, k2, k3, k4 = jax.random.split(key, 4)
    bound1 = 1.0 / jnp.sqrt(d_in)
    bound2 = 1.0 / jnp.sqrt(hidden)
    w1 = jax.random.uniform(k1, (d_in, hidden), jnp.float32, -bound1, bound1)
    b1 = jax.random.uniform(k2, (1, hidden), jnp.float32, -bound1, bound1)
    w2 = jax.random.uniform(k3, (hidden, nactions), jnp.float32, -bound2, bound2)
    b2 = jax.random.uniform(k4, (1, nactions), jnp.float32, -bound2, bound2)
    w2p = jnp.zeros((hidden, A_PAD), jnp.float32).at[:, :nactions].set(w2)
    b2p = jnp.full((1, A_PAD), NEG_MASK, jnp.float32).at[:, :nactions].set(b2)
    return (w1.astype(jnp.bfloat16), b1,
            w2p.astype(jnp.bfloat16), b2p)


def net_reference(x, w1, b1, w2, b2, n_actions):
    """Pure-JAX reference with the same bf16/f32 precision choices."""
    xb = x.astype(jnp.bfloat16)
    h = jnp.dot(xb, w1, preferred_element_type=jnp.float32) + b1
    h = jnp.maximum(h, 0.0)
    logits = jnp.dot(h.astype(jnp.bfloat16), w2,
                     preferred_element_type=jnp.float32) + b2
    return jax.nn.softmax(logits[:, :n_actions], axis=-1)


if __name__ == "__main__":
    key = jax.random.PRNGKey(0)

    Nstates = 4        # -> input dim = 4*4*4 = 64
    NActions = 4
    batch = 8          # small demo batch (one grid step)

    kx, kp = jax.random.split(key)
    D = Nstates * Nstates * 4
    # The producer (replay buffer) emits states directly in bf16: halves the
    # dominant HBM stream with no separate wrapper cast op.
    x = jax.random.normal(kx, (batch, D), jnp.bfloat16)
    w1, b1, w2, b2 = init_params(kp, Nstates, NActions)

    out = net_forward(x, w1, b1, w2, b2)
    out = jax.block_until_ready(out)

    # sanity: lane-padded shape, padded lanes exactly zero, rows sum to 1,
    # and the real columns match the pure-JAX reference
    assert out.shape == (batch, A_PAD)
    assert bool(jnp.all(out[:, NActions:] == 0.0))
    probs = out[:, :NActions]
    assert bool(jnp.allclose(jnp.sum(probs, axis=1), 1.0, atol=1e-3))
    ref = net_reference(x, w1, b1, w2, b2, NActions)
    assert bool(jnp.allclose(probs, ref, atol=2e-3))

    print("KERNEL_OK")
</pallas_src>

<mosaic_0001>
module attributes {stable_mosaic.version = 11 : i64} {
  func.func @net_kernel(%arg0: i32, %arg1: memref<8x64xbf16, #tpu.memory_space<vmem>>, %arg2: memref<64x256xbf16, #tpu.memory_space<vmem>>, %arg3: memref<1x256xf32, #tpu.memory_space<vmem>>, %arg4: memref<256x128xbf16, #tpu.memory_space<vmem>>, %arg5: memref<1x128xf32, #tpu.memory_space<vmem>>, %arg6: memref<8x128xf32, #tpu.memory_space<vmem>>) attributes {dimension_semantics = [#tpu.dimension_semantics<parallel>], iteration_bounds = array<i64: 1>, scalar_prefetch = 0 : i64, scratch_operands = 0 : i64, tpu.core_type = #tpu.core_type<tc>, window_params = [{transform_indices = @transform_0, window_bounds = array<i64: 8, 64>}, {pipeline_mode = #tpu.pipeline_mode<synchronous>, transform_indices = @transform_1, window_bounds = array<i64: 64, 256>}, {pipeline_mode = #tpu.pipeline_mode<synchronous>, transform_indices = @transform_2, window_bounds = array<i64: 1, 256>}, {pipeline_mode = #tpu.pipeline_mode<synchronous>, transform_indices = @transform_3, window_bounds = array<i64: 256, 128>}, {pipeline_mode = #tpu.pipeline_mode<synchronous>, transform_indices = @transform_4, window_bounds = array<i64: 1, 128>}, {transform_indices = @transform_5, window_bounds = array<i64: 8, 128>}]} {
    %c0 = arith.constant 0 : index
    %c0_0 = arith.constant 0 : index
    %0 = vector.load %arg1[%c0, %c0_0] : memref<8x64xbf16, #tpu.memory_space<vmem>>, vector<8x64xbf16>
    %c0_1 = arith.constant 0 : index
    %c0_2 = arith.constant 0 : index
    %1 = vector.load %arg2[%c0_1, %c0_2] : memref<64x256xbf16, #tpu.memory_space<vmem>>, vector<64x256xbf16>
    %cst = arith.constant dense<0.000000e+00> : vector<8x256xf32>
    %2 = tpu.matmul %0, %1, %cst {dimension_numbers = #tpu.dot_dimension_numbers<[1], [0], [0], [1], [0, 0, 1, 1], [], []>} : vector<8x64xbf16>, vector<64x256xbf16>, vector<8x256xf32> -> vector<8x256xf32>
    %c0_3 = arith.constant 0 : index
    %c0_4 = arith.constant 0 : index
    %3 = vector.load %arg3[%c0_3, %c0_4] : memref<1x256xf32, #tpu.memory_space<vmem>>, vector<1x256xf32>
    %4 = vector.broadcast %3 : vector<1x256xf32> to vector<8x256xf32>
    %5 = arith.addf %2, %4 : vector<8x256xf32>
    %cst_5 = arith.constant 0.000000e+00 : f32
    %6 = vector.broadcast %cst_5 : f32 to vector<8x256xf32>
    %7 = arith.maximumf %5, %6 : vector<8x256xf32>
    %8 = arith.truncf %7 : vector<8x256xf32> to vector<8x256xbf16>
    %c0_6 = arith.constant 0 : index
    %c0_7 = arith.constant 0 : index
    %9 = vector.load %arg4[%c0_6, %c0_7] : memref<256x128xbf16, #tpu.memory_space<vmem>>, vector<256x128xbf16>
    %cst_8 = arith.constant dense<0.000000e+00> : vector<8x128xf32>
    %10 = tpu.matmul %8, %9, %cst_8 {dimension_numbers = #tpu.dot_dimension_numbers<[1], [0], [0], [1], [0, 0, 1, 1], [], []>} : vector<8x256xbf16>, vector<256x128xbf16>, vector<8x128xf32> -> vector<8x128xf32>
    %c0_9 = arith.constant 0 : index
    %c0_10 = arith.constant 0 : index
    %11 = vector.load %arg5[%c0_9, %c0_10] : memref<1x128xf32, #tpu.memory_space<vmem>>, vector<1x128xf32>
    %12 = vector.broadcast %11 : vector<1x128xf32> to vector<8x128xf32>
    %13 = arith.addf %10, %12 : vector<8x128xf32>
    %cst_11 = arith.constant dense<0xFF800000> : vector<8xf32>
    %14 = vector.multi_reduction <maximumf>, %13, %cst_11 [1] : vector<8x128xf32> to vector<8xf32>
    %15 = vector.shape_cast %14 : vector<8xf32> to vector<8x1xf32>
    %16 = vector.broadcast %15 : vector<8x1xf32> to vector<8x128xf32>
    %17 = arith.subf %13, %16 : vector<8x128xf32>
    %18 = math.exp %17 : vector<8x128xf32>
    %cst_12 = arith.constant dense<0.000000e+00> : vector<8xf32>
    %19 = vector.multi_reduction <add>, %18, %cst_12 [1] : vector<8x128xf32> to vector<8xf32>
    %20 = vector.shape_cast %19 : vector<8xf32> to vector<8x1xf32>
    %21 = tpu.reciprocal %20 : vector<8x1xf32> -> vector<8x1xf32>
    %22 = vector.broadcast %21 : vector<8x1xf32> to vector<8x128xf32>
    %23 = arith.mulf %18, %22 : vector<8x128xf32>
    %c0_13 = arith.constant 0 : index
    %c0_14 = arith.constant 0 : index
    %24 = vector.load %arg6[%c0_13, %c0_14] : memref<8x128xf32, #tpu.memory_space<vmem>>, vector<8x128xf32>
    tpu.vector_store %arg6[%c0_13, %c0_14], %23 {strides = array<i32>} : memref<8x128xf32, #tpu.memory_space<vmem>>, vector<8x128xf32>,
    return
  }
  func.func @transform_0(%arg0: i32) -> (i32, i32) {
    %c0_i32 = arith.constant 0 : i32
    %c0_i32_0 = arith.constant 0 : i32
    return %arg0, %c0_i32 : i32, i32
  }
  func.func @transform_1(%arg0: i32) -> (i32, i32) {
    %c0_i32 = arith.constant 0 : i32
    %c0_i32_0 = arith.constant 0 : i32
    %c0_i32_1 = arith.constant 0 : i32
    return %c0_i32, %c0_i32_0 : i32, i32
  }
  func.func @transform_2(%arg0: i32) -> (i32, i32) {
    %c0_i32 = arith.constant 0 : i32
    %c0_i32_0 = arith.constant 0 : i32
    %c0_i32_1 = arith.constant 0 : i32
    return %c0_i32, %c0_i32_0 : i32, i32
  }
  func.func @transform_3(%arg0: i32) -> (i32, i32) {
    %c0_i32 = arith.constant 0 : i32
    %c0_i32_0 = arith.constant 0 : i32
    %c0_i32_1 = arith.constant 0 : i32
    return %c0_i32, %c0_i32_0 : i32, i32
  }
  func.func @transform_4(%arg0: i32) -> (i32, i32) {
    %c0_i32 = arith.constant 0 : i32
    %c0_i32_0 = arith.constant 0 : i32
    %c0_i32_1 = arith.constant 0 : i32
    return %c0_i32, %c0_i32_0 : i32, i32
  }
  func.func @transform_5(%arg0: i32) -> (i32, i32) {
    %c0_i32 = arith.constant 0 : i32
    %c0_i32_0 = arith.constant 0 : i32
    return %arg0, %c0_i32 : i32, i32
  }
}

</mosaic_0001>

<bundles_post_ra>
// kernel: tpu_custom_call.1
= control target key start
LH: loop header
LB: loop body
LE: loop exit
PB: predicated region body
PF: predicated region fallthrough
CT: control target
= control target key end

     0   :  { %10 = vsyncpa [#allocation3], 0  ;;  %s648_s0 = inlined_call_operand.hbm [shape: bf16[8,64], index: 0, kind: input, shape index: {}]   ;;  %s649_s1 = inlined_call_operand.hbm [shape: bf16[64,256], index: 1, kind: input, shape index: {}]   ;;  %s650_s2 = inlined_call_operand.vmem [shape: f32[1,256], index: 2, kind: input, shape index: {}]   ;;  %s651_s3 = inlined_call_operand.hbm [shape: bf16[256,128], index: 3, kind: input, shape index: {}]   ;;  %s652_s4 = inlined_call_operand.vmem [shape: f32[1,128], index: 4, kind: input, shape index: {}]   ;;  %s653_s5 = inlined_call_operand.hbm [shape: f32[8,128], index: 5, kind: output, shape index: {}]  }
   0x1   :  { %11 = vsyncpa [#allocation6], 0 }
   0x2   :  { %12 = vsyncpa [#allocation4], 0  ;;  %s555_s18 = smov [#allocation5]   ;;  %s461_s22 = scalar_lea.hbm %s649_s1, 1024 }
   0x3   :  { %s28_s19 = sshll.u32 %s555_s18, 4  ;;  %p462_p0 = scmp.ne.s32.totalorder %s649_s1, %s461_s22  ;;  %s29_s19 = int_to_ptr.vmem [resolvable:$true] %s28_s19 }
   0x4   :  { %p465_p1 = scmp.lt.u32.totalorder %s461_s22, %s649_s1 }
   0x6   :  { %p467_p2 = pnand %p465_p1, %p462_p0 }
   0x8   :  { %470 = shalt.err (!%p467_p2)
}
   0x9   :  { %s471_s27 = scalar_lea.vmem %s29_s19, 1024  ;;  %p476_p4 = scmp.lt.s32.totalorder %s29_s19, %s29_s19 }
   0xa   :  { %p472_p3 = scmp.ne.s32.totalorder %s29_s19, %s471_s27  ;;  %p477_p5 = scmp.lt.s32.totalorder %s471_s27, %s471_s27 }
   0xc   :  { %p478_p6 = por %p477_p5, %p476_p4 }
   0xe   :  { %p479_p7 = pnand %p478_p6, %p472_p3 }
  0x10   :  { %482 = shalt.err (!%p479_p7)
}
  0x11   :  { %s556_s28 = smov 128   ;;  %s557_s29 = smov 8  }
  0x12   :  { %34 = dma.hbm_to_vmem [thread:$0]  %s649_s1, 1024, %s29_s19, [#allocation6], %s556_s28, %s556_s28, %s557_s29  }
  0x13   :  { %s558_s7 = smov [#allocation2]   ;;  %s559_s9 = smov [#allocation7]  }
  0x14   :  { %s19_s8 = sshll.u32 %s558_s7, 4  ;;  %s42_s10 = sshll.u32 %s559_s9, 4  ;;  %s20_s8 = int_to_ptr.vmem [resolvable:$true] %s19_s8  ;;  %s43_s10 = int_to_ptr.vmem [resolvable:$true] %s42_s10 }
  0x15   :  { %s483_s13 = scalar_lea.hbm %s648_s0, 64 }
  0x16   :  { %p484_p8 = scmp.ne.s32.totalorder %s648_s0, %s483_s13  ;;  %p487_p9 = scmp.lt.u32.totalorder %s483_s13, %s648_s0 }
  0x18   :  { %p489_p10 = pnand %p487_p9, %p484_p8 }
  0x1a   :  { %492 = shalt.err (!%p489_p10)
}
  0x1b   :  { %s493_s1 = scalar_lea.vmem %s20_s8, 64  ;;  %p498_p12 = scmp.lt.s32.totalorder %s20_s8, %s20_s8 }
  0x1c   :  { %p494_p11 = scmp.ne.s32.totalorder %s20_s8, %s493_s1  ;;  %p499_p13 = scmp.lt.s32.totalorder %s493_s1, %s493_s1 }
  0x1e   :  { %p500_p0 = por %p499_p13, %p498_p12 }
  0x20   :  { %p501_p1 = pnand %p500_p0, %p494_p11 }
  0x22   :  { %504 = shalt.err (!%p501_p1)
}
  0x23   :  { %22 = dma.hbm_to_vmem [thread:$0]  %s648_s0, 64, %s20_s8, [#allocation3]  }
  0x24   :  { %s505_s22 = scalar_lea.hbm %s651_s3, 2048 }
  0x25   :  { %p506_p2 = scmp.ne.s32.totalorder %s651_s3, %s505_s22  ;;  %p509_p3 = scmp.lt.u32.totalorder %s505_s22, %s651_s3 }
  0x27   :  { %p511_p4 = pnand %p509_p3, %p506_p2 }
  0x29   :  { %514 = shalt.err (!%p511_p4)
}
  0x2a   :  { %s515_s27 = scalar_lea.vmem %s43_s10, 2048  ;;  %p520_p6 = scmp.lt.s32.totalorder %s43_s10, %s43_s10 }
  0x2b   :  { %p516_p5 = scmp.ne.s32.totalorder %s43_s10, %s515_s27  ;;  %p521_p7 = scmp.lt.s32.totalorder %s515_s27, %s515_s27 }
  0x2d   :  { %p522_p8 = por %p521_p7, %p520_p6 }
  0x2f   :  { %p523_p9 = pnand %p522_p8, %p516_p5 }
  0x31   :  { %526 = shalt.err (!%p523_p9)
}
  0x32   :  { %s560_s0 = smov 64   ;;  %s561_s28 = smov 4  }
  0x33   :  { %48 = dma.hbm_to_vmem [thread:$0]  %s651_s3, 2048, %s43_s10, [#allocation6], %s560_s0, %s560_s0, %s561_s28  }
  0x34   :  { %549 = dma.done.wait [#allocation3], 64  }
  0x35   :  { %550 = vsyncadd [#allocation3], 4294967232 }
  0x36   :  { %551 = dma.done.wait [#allocation6], 3072  }
  0x37   :  { %552 = vsyncadd [#allocation6], 4294964224  ;;  %v562_v0 = vmov 0   ;;  %v429_v1 = vld [vmem:[#allocation5 + $0x4] ss:$8 sps:$4 sm:$0xff]   ;;  %v445_v12 = vld [vmem:[#allocation7 + $0x50] sm:$0xff]   ;;  %v72_v26 = vlaneseq }
  0x38   :  { %158 = vmatprep.mubr.bf16.mxu0 %v562_v0  ;;  %v431_v2 = vld [vmem:[#allocation5] ss:$8 sps:$4 sm:$0xff]   ;;  %126 = vmatprep.subr.bf16.mxu0 %v429_v1  ;;  %v432_v3 = vld [vmem:[#allocation5 + $0x14] ss:$8 sps:$4 sm:$0xff]   ;;  %v434_v4 = vld [vmem:[#allocation5 + $0x10] ss:$8 sps:$4 sm:$0xff]  }
  0x39   :  { %127 = vmatpush1.bf16.msra.mxu0 %v431_v2  ;;  %v435_v5 = vld [vmem:[#allocation5 + $0x24] ss:$8 sps:$4 sm:$0xff]   ;;  %v437_v6 = vld [vmem:[#allocation5 + $0x20] ss:$8 sps:$4 sm:$0xff]   ;;  %v438_v7 = vld [vmem:[#allocation5 + $0x34] ss:$8 sps:$4 sm:$0xff]  }
  0x3a   :  { %128 = vmatprep.subr.bf16.mxu0 %v432_v3  ;;  %v441_v8 = vld [vmem:[#allocation7 + $0x40] sm:$0xff]   ;;  %v443_v10 = vld [vmem:[#allocation7 + $0x48] sm:$0xff]   ;;  %v440_v13 = vld [vmem:[#allocation5 + $0x30] ss:$8 sps:$4 sm:$0xff]   ;;  %vm122_vm0 = vcmask 523264   ;;  %v73_v27 = vshrl.u32 %v72_v26, 7 }
  0x3b   :  { %v442_v9 = vld [vmem:[#allocation7] sm:$0xff]   ;;  %398 = vmatprep.subr.bf16.mxu1 %v441_v8  ;;  %v444_v11 = vld [vmem:[#allocation7 + $0x8] sm:$0xff]   ;;  %v446_v14 = vld [vmem:[#allocation7 + $0x10] sm:$0xff]  }
  0x3c   :  { %399 = vmatpush3.bf16.msra.mxu1 %v442_v9  ;;  %v447_v15 = vld [vmem:[#allocation7 + $0x58] sm:$0xff]   ;;  %v449_v18 = vld [vmem:[#allocation7 + $0x60] sm:$0xff]   ;;  %v451_v20 = vld [vmem:[#allocation7 + $0x68] sm:$0xff]   ;;  %v74_v28 = vsub.s32 0, %v73_v27  ;;  %v78_v30 = vsub.s32 1, %v73_v27 }
  0x3d   :  { %129 = vmatpush1.bf16.msra.mxu0 %v434_v4  ;;  %400 = vmatprep.subr.bf16.mxu1 %v443_v10  ;;  %v61_v16 = vld [vmem:[#allocation2] sm:$0xf]  ;;  %v450_v19 = vld [vmem:[#allocation7 + $0x20] sm:$0xff]   ;;  %v452_v21 = vld [vmem:[#allocation7 + $0x28] sm:$0xff]  }
  0x3e   :  { %130 = vmatprep.subr.bf16.mxu0 %v435_v5  ;;  %v448_v17 = vld [vmem:[#allocation7 + $0x18] sm:$0xff]   ;;  %v453_v22 = vld [vmem:[#allocation7 + $0x70] sm:$0xff]  }
  0x3f   :  { %v454_v23 = vld [vmem:[#allocation7 + $0x30] sm:$0xff]   ;;  %v455_v24 = vld [vmem:[#allocation7 + $0x78] sm:$0xff]  }
  0x40   :  { %401 = vmatpush3.bf16.msra.mxu1 %v444_v11  ;;  %v456_v25 = vld [vmem:[#allocation7 + $0x38] sm:$0xff]  }
  0x41   :  { %131 = vmatpush1.bf16.msra.mxu0 %v437_v6  ;;  %402 = vmatprep.subr.bf16.mxu1 %v445_v12  ;;  %v70_v29 = vld [vmem:[%s650_s2] sm:$0x3]  ;;  %s563_s2 = smov [#allocation8]  }
  0x42   :  { %132 = vmatprep.subr.bf16.mxu0 %v438_v7  ;;  %v75_v31 = vrot.slane %v70_v29, %v74_v28  ;;  %v79_v32 = vrot.slane %v70_v29, %v78_v30  ;;  %v381_v45 = vld [vmem:[%s652_s4] ss:$0 sm:$0xff]  ;;  %s362_s9 = sshll.u32 %s563_s2, 4  ;;  %s363_s9 = int_to_ptr.vmem [resolvable:$true] %s362_s9 }
  0x43   :  { %s527_s4 = scalar_lea.vmem %s363_s9, 128  ;;  %p532_p11 = scmp.lt.s32.totalorder %s363_s9, %s363_s9 }
  0x44   :  { %403 = vmatpush3.bf16.msra.mxu1 %v446_v14  ;;  %p528_p10 = scmp.ne.s32.totalorder %s363_s9, %s527_s4  ;;  %p533_p12 = scmp.lt.s32.totalorder %s527_s4, %s527_s4 }
  0x45   :  { %133 = vmatpush1.bf16.msra.mxu0 %v440_v13  ;;  %404 = vmatprep.subr.bf16.mxu1 %v447_v15 }
  0x46   :  { %p534_p13 = por %p533_p12, %p532_p11 }
  0x48   :  { %380 = vmatmul.mubr.msk.bf16.vlgmr.msra.gmra.mrb[0].mxu0 %vm122_vm0, %v61_v16  ;;  %405 = vmatpush3.bf16.msra.mxu1 %v448_v17  ;;  %p535_p0 = pnand %p534_p13, %p528_p10 }
  0x49   :  { %406 = vmatprep.subr.bf16.mxu1 %v449_v18 }
  0x4c   :  { %407 = vmatpush3.bf16.msra.mxu1 %v450_v19 }
  0x4d   :  { %408 = vmatprep.subr.bf16.mxu1 %v451_v20 }
  0x50   :  { %409 = vmatpush3.bf16.msra.mxu1 %v452_v21 }
  0x51   :  { %410 = vmatprep.subr.bf16.mxu1 %v453_v22 }
  0x54   :  { %411 = vmatpush3.bf16.msra.mxu1 %v454_v23 }
  0x55   :  { %412 = vmatprep.subr.bf16.mxu1 %v455_v24 }
  0x58   :  { %413 = vmatpush3.bf16.msra.mxu1 %v456_v25 }
 0x11b   :  { %v160_v33 = vpop.f32.mrb[0].mxu0 }
 0x11c   :  { %v161_v34 = vadd.f32 %v160_v33, %v75_v31  ;;  %v162_v35 = vpop.f32.mrb[1].mxu0 }
 0x11d   :  { %v163_v36 = vadd.f32 %v162_v35, %v79_v32  ;;  %v164_v37 = vpop.f32.mrb[2].mxu0 }
 0x11e   :  { %v167_v38 = vmax.f32 %v161_v34, 0.0  ;;  %v165_v39 = vpop.f32.mrb[3].mxu0 }
 0x11f   :  { %v168_v40 = vmax.f32 %v163_v36, 0.0 }
 0x120   :  { %v169_v42 = vpack.c.bf16 %v167_v38, %v167_v38 }
 0x121   :  { %v170_v41 = vpack.c.bf16 %v168_v40, %v168_v40 }
 0x123   :  { %338 = vmatprep.mubr.bf16.mxu1 %v170_v41 }
 0x124   :  { %339 = vmatmul.mubr.bf16.vlgmr.msra.gmra.mrb[0].mxu1 %v169_v42 }
 0x1f7   :  { %v414_v43 = vpop.f32.mrb[0].mxu1 }
 0x1f8   :  { %v415_v44 = vpop.f32.mrb[1].mxu1 }
 0x1f9   :  { %v416_v46 = vadd.f32 %v415_v44, %v414_v43  ;;  %v417_v47 = vpop.f32.mrb[2].mxu1 }
 0x1fa   :  { %v418_v48 = vpop.f32.mrb[3].mxu1 }
 0x1fb   :  { %v341_v49 = vadd.f32 %v416_v46, %v381_v45 }
 0x1fd   :  { %346 = vmax.xlane.f32.xlu0 %v341_v49 }
 0x28a   :  { %v347_v50 = vpop.xlane.xlu0 %346 }
 0x28b   :  { %v348_v51 = vsub.f32 %v341_v49, %v347_v50 }
 0x28d   :  { %v349_v52 = vmul.f32 1.442695, %v348_v51 }
 0x28f   :  { %457 = vpow2.f32 %v349_v52 }
 0x299   :  { %v458_v53 = vpop.eup %457 }
 0x29a   :  { %351 = vadd.xlane.f32.xlu0 %v458_v53 }
 0x327   :  { %v352_v54 = vpop.xlane.xlu0 %351 }
 0x328   :  { %459 = vrcp.f32 %v352_v54 }
 0x332   :  { %v460_v55 = vpop.eup %459 }
 0x333   :  { %v354_v56 = vmul.f32 %v460_v55, %v458_v53 }
 0x335   :  { %355 = vst [vmem:[#allocation8] sm:$0xff] %v354_v56 }
 0x336   :  { %538 = shalt.err (!%p535_p0)
}
 0x337   :  { %s539_s12 = scalar_lea.hbm %s653_s5, 128 }
 0x338   :  { %p540_p1 = scmp.ne.s32.totalorder %s653_s5, %s539_s12  ;;  %p543_p2 = scmp.lt.u32.totalorder %s539_s12, %s653_s5 }
 0x33a   :  { %p545_p3 = pnand %p543_p2, %p540_p1 }
 0x33c   :  { %548 = shalt.err (!%p545_p3)
}
 0x33d   :  { %365 = dma.vmem_to_hbm [thread:$0]  %s363_s9, 128, %s653_s5, [#allocation4]  }
 0x33e   :  { %553 = dma.done.wait [#allocation4], 128  }
 0x33f   :  { %554 = vsyncadd [#allocation4], 4294967168 }
 0x340   :  { %369 = vsyncpa [#allocation3], 1 }
 0x341   :  { %370 = vsyncpa [#allocation6], 1 }
 0x342   :  { %371 = vsyncpa [#allocation4], 1 }

</bundles_post_ra>
